<compile_context>
chip_gen: v7x
topology: tpu7x:2x2x1
jax: 0.10.0
libtpu: 0.0.40
codegen_flags: <defaults>
</compile_context>

<pallas_src>
import math

import jax
import jax.numpy as jnp
from jax.experimental import pallas as pl
from jax.experimental.pallas import tpu as pltpu


def _round_up(x, m):
    return ((x + m - 1) // m) * m


def attention_kernel(x_ref, wqkv_ref, bqkv_ref, o_ref):
    """One grid step: Bt batch elements of fused-QKV projection + attention.

    x_ref    : (Bt, S, D_in)  f32  (cast to bf16 in-kernel for the MXU)
    wqkv_ref : (D_in, 3*Dp)   bf16 pre-fused, pre-transposed, lane-padded
                                   [Wq/sqrt(dk) | Wk | Wv], Dp = 128-padded head
    bqkv_ref : (1, 3*Dp)      f32  pre-fused, lane-padded [bq/sqrt(dk) | bk | bv]
    o_ref    : (Bt, S, Dp)    f32  lane-dense (128-wide) output, sliced in wrapper
    """
    Bt, S, D_in = x_ref.shape
    D3 = wqkv_ref.shape[1]
    Dp = D3 // 3

    # Flatten (Bt, S, D_in) -> (Bt*S, D_in): layout-free because the wrapper
    # asserts S % 8 == 0 (sublane tile).  The bf16 cast of the activation is
    # done here instead of as a separate XLA op in the wrapper.
    x2 = x_ref[...].reshape(Bt * S, D_in).astype(jnp.bfloat16)

    # Fused Q/K/V projection: one MXU pass, bf16 operands, f32 accumulation.
    # 1/sqrt(dk) is already folded into the Q weight/bias columns.
    qkv = jnp.dot(x2, wqkv_ref[...], preferred_element_type=jnp.float32)
    qkv = qkv + bqkv_ref[...]                                    # broadcast bias
    qkv = qkv.reshape(Bt, S, D3)

    # Static, 128-lane-aligned slices -> no lane-offset relayouts.
    q = qkv[:, :, :Dp]
    k = qkv[:, :, Dp:2 * Dp]
    v = qkv[:, :, 2 * Dp:]

    # scores = (Q/sqrt(dk)) @ K^T : last-dim-contracting batched einsum (no
    # transposed copy of K through the XLU).  Zero-padded lanes contribute 0.
    scores = jnp.einsum("bqd,bkd->bqk",
                        q.astype(jnp.bfloat16), k.astype(jnp.bfloat16),
                        preferred_element_type=jnp.float32)      # (Bt, S, S)

    # Numerically stable softmax kept in f32 (safe on v5e); the approximate
    # reciprocal routes to the EUP slot.
    m = jnp.max(scores, axis=-1, keepdims=True)
    e = jnp.exp(scores - m)
    denom = jnp.sum(e, axis=-1, keepdims=True)
    p = e * pl.reciprocal(denom, approx=True)                    # (Bt, S, S)

    # attention_final = softmax(scores) @ V.  Padded V lanes are zero, so the
    # padded output lanes are exact zeros too.
    out = jnp.einsum("bqk,bkd->bqd",
                     p.astype(jnp.bfloat16), v.astype(jnp.bfloat16),
                     preferred_element_type=jnp.float32)         # (Bt, S, Dp)
    o_ref[...] = out.astype(o_ref.dtype)


def fuse_attention_params(wq, bq, wk, bk, wv, bv, *, lane=128):
    """Once-per-module parameter prep (hoisted OUT of the per-forward path).

    - fuses [Wq | Wk | Wv] into one pre-transposed (D_in, 3*Dp) matrix,
    - folds 1/sqrt(dk) into the Q weight and bias,
    - zero-pads each head from D_out to Dp = round_up(D_out, 128) lanes so all
      kernel loads/stores (and the output) are lane-dense and tile-aligned,
    - casts the fused weight to bf16 (MXU-native); bias stays f32.
    """
    D_out, D_in = wq.shape
    Dp = _round_up(D_out, lane)
    inv_sqrt_dk = 1.0 / math.sqrt(D_out)

    def head(w, b, scale):
        wt = (w.astype(jnp.float32) * scale).T                   # (D_in, D_out)
        wt = jnp.pad(wt, ((0, 0), (0, Dp - D_out)))
        bp = jnp.pad(b.astype(jnp.float32) * scale, (0, Dp - D_out))
        return wt, bp

    wq_p, bq_p = head(wq, bq, inv_sqrt_dk)
    wk_p, bk_p = head(wk, bk, 1.0)
    wv_p, bv_p = head(wv, bv, 1.0)

    wqkv = jnp.concatenate([wq_p, wk_p, wv_p], axis=1).astype(jnp.bfloat16)
    bqkv = jnp.concatenate([bq_p, bk_p, bv_p], axis=0).reshape(1, 3 * Dp)
    return wqkv, bqkv.astype(jnp.float32)


def _pick_batch_tile(B, max_tile):
    """Largest divisor of B that is <= max_tile.  At these shapes the kernel is
    entirely overhead-bound, so a single grid step (Bt=B, grid=(1,)) wins on
    single-TC chips (v5e/v6e) and ties/wins on v7x — cross-core sharding only
    pays once per-block compute greatly exceeds the ~600-cycle step cost."""
    for d in range(min(B, max_tile), 0, -1):
        if B % d == 0:
            return d
    return 1


def attention_forward(x, wqkv, bqkv, d_out, *, max_batch_tile=8):
    """x: [B, S, D_in] f32; (wqkv, bqkv) from fuse_attention_params.
    Returns [B, S, d_out] f32."""
    B, S, D_in = x.shape
    D3 = wqkv.shape[1]
    Dp = D3 // 3
    # Keeps the in-kernel (Bt, S, D) -> (Bt*S, D) flatten a pure layout no-op.
    assert S % 8 == 0, "S must be a multiple of the 8-sublane tile"
    Bt = _pick_batch_tile(B, max_batch_tile)

    out_padded = pl.pallas_call(
        attention_kernel,
        out_shape=jax.ShapeDtypeStruct((B, S, Dp), jnp.float32),
        grid_spec=pltpu.PrefetchScalarGridSpec(
            num_scalar_prefetch=0,
            grid=(B // Bt,),
            in_specs=[
                pl.BlockSpec((Bt, S, D_in), lambda b: (b, 0, 0)),   # x
                pl.BlockSpec((D_in, D3), lambda b: (0, 0)),         # W_qkv (const)
                pl.BlockSpec((1, D3), lambda b: (0, 0)),            # b_qkv (const)
            ],
            out_specs=pl.BlockSpec((Bt, S, Dp), lambda b: (b, 0, 0)),
        ),
        compiler_params=pltpu.CompilerParams(
            dimension_semantics=("parallel",)),
    )(x, wqkv, bqkv)

    # Drop the zero lane padding; negligible at D_out=32.
    return out_padded[:, :, :d_out]


def reference_forward(x, wq, bq, wk, bk, wv, bv):
    """Plain-JAX f32 reference mirroring the PyTorch semantics."""
    q = x @ wq.T + bq
    k = x @ wk.T + bk
    v = x @ wv.T + bv
    dk = wq.shape[0]
    scores = jnp.einsum("bqd,bkd->bqk", q, k) / jnp.sqrt(jnp.float32(dk))
    weights = jax.nn.softmax(scores, axis=-1)
    return jnp.einsum("bqk,bkd->bqd", weights, v)


if __name__ == "__main__":
    # Small shapes consistent with the module: batch=2, seq=8, input_dim=32,
    # output_dim=32.
    B, S, D_in, D_out = 2, 8, 32, 32

    key = jax.random.PRNGKey(0)
    kx, kq, kbq, kk, kbk, kv, kbv = jax.random.split(key, 7)

    # Deterministic init mimicking nn.Linear (uniform in +/- 1/sqrt(fan_in)).
    bound = 1.0 / jnp.sqrt(jnp.float32(D_in))
    x = jax.random.normal(kx, (B, S, D_in), dtype=jnp.float32)
    wq = jax.random.uniform(kq, (D_out, D_in), minval=-bound, maxval=bound)
    bq = jax.random.uniform(kbq, (D_out,), minval=-bound, maxval=bound)
    wk = jax.random.uniform(kk, (D_out, D_in), minval=-bound, maxval=bound)
    bk = jax.random.uniform(kbk, (D_out,), minval=-bound, maxval=bound)
    wv = jax.random.uniform(kv, (D_out, D_in), minval=-bound, maxval=bound)
    bv = jax.random.uniform(kbv, (D_out,), minval=-bound, maxval=bound)

    # One-time parameter fusion (module init), NOT on the per-forward path.
    wqkv, bqkv = fuse_attention_params(wq, bq, wk, bk, wv, bv)
    wqkv, bqkv = jax.block_until_ready((wqkv, bqkv))

    out = attention_forward(x, wqkv, bqkv, D_out)
    out = jax.block_until_ready(out)

    ref = reference_forward(x, wq, bq, wk, bk, wv, bv)
    assert out.shape == (B, S, D_out)
    # bf16 MXU operands + approx reciprocal -> loosen tolerance vs f32 reference.
    assert jnp.allclose(out, ref, atol=3e-2, rtol=3e-2), "mismatch vs reference"

    print("KERNEL_OK")
</pallas_src>

<mosaic_0001>
module attributes {stable_mosaic.version = 11 : i64} {
  func.func @attention_kernel(%arg0: i32, %arg1: memref<2x8x32xf32, #tpu.memory_space<vmem>>, %arg2: memref<32x384xbf16, #tpu.memory_space<vmem>>, %arg3: memref<1x384xf32, #tpu.memory_space<vmem>>, %arg4: memref<2x8x128xf32, #tpu.memory_space<vmem>>) attributes {dimension_semantics = [#tpu.dimension_semantics<parallel>], iteration_bounds = array<i64: 1>, scalar_prefetch = 0 : i64, scratch_operands = 0 : i64, tpu.core_type = #tpu.core_type<tc>, window_params = [{transform_indices = @transform_0, window_bounds = array<i64: 2, 8, 32>}, {pipeline_mode = #tpu.pipeline_mode<synchronous>, transform_indices = @transform_1, window_bounds = array<i64: 32, 384>}, {pipeline_mode = #tpu.pipeline_mode<synchronous>, transform_indices = @transform_2, window_bounds = array<i64: 1, 384>}, {transform_indices = @transform_3, window_bounds = array<i64: 2, 8, 128>}]} {
    %c0 = arith.constant 0 : index
    %c0_0 = arith.constant 0 : index
    %c0_1 = arith.constant 0 : index
    %0 = vector.load %arg1[%c0, %c0_0, %c0_1] : memref<2x8x32xf32, #tpu.memory_space<vmem>>, vector<2x8x32xf32>
    %1 = vector.shape_cast %0 : vector<2x8x32xf32> to vector<16x32xf32>
    %2 = arith.truncf %1 : vector<16x32xf32> to vector<16x32xbf16>
    %c0_2 = arith.constant 0 : index
    %c0_3 = arith.constant 0 : index
    %3 = vector.load %arg2[%c0_2, %c0_3] : memref<32x384xbf16, #tpu.memory_space<vmem>>, vector<32x384xbf16>
    %cst = arith.constant dense<0.000000e+00> : vector<16x384xf32>
    %4 = tpu.matmul %2, %3, %cst {dimension_numbers = #tpu.dot_dimension_numbers<[1], [0], [0], [1], [0, 0, 1, 1], [], []>} : vector<16x32xbf16>, vector<32x384xbf16>, vector<16x384xf32> -> vector<16x384xf32>
    %c0_4 = arith.constant 0 : index
    %c0_5 = arith.constant 0 : index
    %5 = vector.load %arg3[%c0_4, %c0_5] : memref<1x384xf32, #tpu.memory_space<vmem>>, vector<1x384xf32>
    %6 = vector.broadcast %5 : vector<1x384xf32> to vector<16x384xf32>
    %7 = arith.addf %4, %6 : vector<16x384xf32>
    %8 = vector.shape_cast %7 : vector<16x384xf32> to vector<2x8x384xf32>
    %9 = vector.extract_strided_slice %8 {offsets = [0, 0, 0], sizes = [2, 8, 128], strides = [1, 1, 1]} : vector<2x8x384xf32> to vector<2x8x128xf32>
    %10 = vector.extract_strided_slice %8 {offsets = [0, 0, 128], sizes = [2, 8, 128], strides = [1, 1, 1]} : vector<2x8x384xf32> to vector<2x8x128xf32>
    %11 = vector.extract_strided_slice %8 {offsets = [0, 0, 256], sizes = [2, 8, 128], strides = [1, 1, 1]} : vector<2x8x384xf32> to vector<2x8x128xf32>
    %12 = arith.truncf %9 : vector<2x8x128xf32> to vector<2x8x128xbf16>
    %13 = arith.truncf %10 : vector<2x8x128xf32> to vector<2x8x128xbf16>
    "tpu.trace_start"() <{level = 10 : i32, message = "bqd,bkd->bqk"}> : () -> ()
    %cst_6 = arith.constant dense<0.000000e+00> : vector<2x8x8xf32>
    %14 = tpu.matmul %12, %13, %cst_6 {dimension_numbers = #tpu.dot_dimension_numbers<[2], [2], [1], [1], [0, 0, 0, 1, 1, 1], [0], [0]>} : vector<2x8x128xbf16>, vector<2x8x128xbf16>, vector<2x8x8xf32> -> vector<2x8x8xf32>
    "tpu.trace_stop"() : () -> ()
    %cst_7 = arith.constant dense<0xFF800000> : vector<2x8xf32>
    %15 = vector.multi_reduction <maximumf>, %14, %cst_7 [2] : vector<2x8x8xf32> to vector<2x8xf32>
    %16 = vector.shape_cast %15 : vector<2x8xf32> to vector<2x8x1xf32>
    %17 = vector.broadcast %16 : vector<2x8x1xf32> to vector<2x8x8xf32>
    %18 = arith.subf %14, %17 : vector<2x8x8xf32>
    %19 = math.exp %18 : vector<2x8x8xf32>
    %cst_8 = arith.constant dense<0.000000e+00> : vector<2x8xf32>
    %20 = vector.multi_reduction <add>, %19, %cst_8 [2] : vector<2x8x8xf32> to vector<2x8xf32>
    %21 = vector.shape_cast %20 : vector<2x8xf32> to vector<2x8x1xf32>
    %22 = tpu.reciprocal %21 {approx = true} : vector<2x8x1xf32> -> vector<2x8x1xf32>
    %23 = vector.broadcast %22 : vector<2x8x1xf32> to vector<2x8x8xf32>
    %24 = arith.mulf %19, %23 : vector<2x8x8xf32>
    %25 = arith.truncf %24 : vector<2x8x8xf32> to vector<2x8x8xbf16>
    %26 = arith.truncf %11 : vector<2x8x128xf32> to vector<2x8x128xbf16>
    "tpu.trace_start"() <{level = 10 : i32, message = "bqk,bkd->bqd"}> : () -> ()
    %cst_9 = arith.constant dense<0.000000e+00> : vector<2x8x128xf32>
    %27 = tpu.matmul %25, %26, %cst_9 {dimension_numbers = #tpu.dot_dimension_numbers<[2], [1], [1], [2], [0, 0, 0, 1, 1, 2], [0], [0]>} : vector<2x8x8xbf16>, vector<2x8x128xbf16>, vector<2x8x128xf32> -> vector<2x8x128xf32>
    "tpu.trace_stop"() : () -> ()
    %c0_10 = arith.constant 0 : index
    %c0_11 = arith.constant 0 : index
    %c0_12 = arith.constant 0 : index
    %28 = vector.load %arg4[%c0_10, %c0_11, %c0_12] : memref<2x8x128xf32, #tpu.memory_space<vmem>>, vector<2x8x128xf32>
    tpu.vector_store %arg4[%c0_10, %c0_11, %c0_12], %27 {strides = array<i32>} : memref<2x8x128xf32, #tpu.memory_space<vmem>>, vector<2x8x128xf32>,
    return
  }
  func.func @transform_0(%arg0: i32) -> (i32, i32, i32) {
    %c0_i32 = arith.constant 0 : i32
    %c0_i32_0 = arith.constant 0 : i32
    %c0_i32_1 = arith.constant 0 : i32
    return %arg0, %c0_i32, %c0_i32_0 : i32, i32, i32
  }
  func.func @transform_1(%arg0: i32) -> (i32, i32) {
    %c0_i32 = arith.constant 0 : i32
    %c0_i32_0 = arith.constant 0 : i32
    %c0_i32_1 = arith.constant 0 : i32
    return %c0_i32, %c0_i32_0 : i32, i32
  }
  func.func @transform_2(%arg0: i32) -> (i32, i32) {
    %c0_i32 = arith.constant 0 : i32
    %c0_i32_0 = arith.constant 0 : i32
    %c0_i32_1 = arith.constant 0 : i32
    return %c0_i32, %c0_i32_0 : i32, i32
  }
  func.func @transform_3(%arg0: i32) -> (i32, i32, i32) {
    %c0_i32 = arith.constant 0 : i32
    %c0_i32_0 = arith.constant 0 : i32
    %c0_i32_1 = arith.constant 0 : i32
    return %arg0, %c0_i32, %c0_i32_0 : i32, i32, i32
  }
}

</mosaic_0001>

<bundles_post_ra>
// kernel: tpu_custom_call.1
= control target key start
LH: loop header
LB: loop body
LE: loop exit
PB: predicated region body
PF: predicated region fallthrough
CT: control target
= control target key end

     0   :  { %8 = vsyncpa [#allocation3], 0  ;;  %s653_s0 = inlined_call_operand.hbm [shape: f32[2,8,32], index: 0, kind: input, shape index: {}]   ;;  %s654_s1 = inlined_call_operand.hbm [shape: bf16[32,384], index: 1, kind: input, shape index: {}]   ;;  %s655_s2 = inlined_call_operand.vmem [shape: f32[1,384], index: 2, kind: input, shape index: {}]   ;;  %s656_s3 = inlined_call_operand.hbm [shape: f32[2,8,128], index: 3, kind: output, shape index: {}]  }
   0x1   :  { %9 = vsyncpa [#allocation6], 0 }
   0x2   :  { %10 = vsyncpa [#allocation4], 0  ;;  %s567_s12 = smov [#allocation2]   ;;  %s495_s16 = scalar_lea.hbm %s653_s0, 256 }
   0x3   :  { %s16_s13 = sshll.u32 %s567_s12, 4  ;;  %p496_p0 = scmp.ne.s32.totalorder %s653_s0, %s495_s16  ;;  %s17_s13 = int_to_ptr.vmem [resolvable:$true] %s16_s13 }
   0x4   :  { %p499_p1 = scmp.lt.u32.totalorder %s495_s16, %s653_s0 }
   0x6   :  { %p501_p2 = pnand %p499_p1, %p496_p0 }
   0x8   :  { %504 = shalt.err (!%p501_p2)
}
   0x9   :  { %s505_s21 = scalar_lea.vmem %s17_s13, 256  ;;  %p510_p4 = scmp.lt.s32.totalorder %s17_s13, %s17_s13 }
   0xa   :  { %p506_p3 = scmp.ne.s32.totalorder %s17_s13, %s505_s21  ;;  %p511_p5 = scmp.lt.s32.totalorder %s505_s21, %s505_s21 }
   0xc   :  { %p512_p6 = por %p511_p5, %p510_p4 }
   0xe   :  { %p513_p7 = pnand %p512_p6, %p506_p3 }
  0x10   :  { %516 = shalt.err (!%p513_p7)
}
  0x11   :  { %s568_s22 = smov 128   ;;  %s569_s23 = smov 8  }
  0x12   :  { %22 = dma.hbm_to_vmem [thread:$0]  %s653_s0, 256, %s17_s13, [#allocation3], %s568_s22, %s568_s22, %s569_s23  }
  0x13   :  { %s570_s26 = smov [#allocation5]   ;;  %s517_s30 = scalar_lea.hbm %s654_s1, 768 }
  0x14   :  { %s28_s27 = sshll.u32 %s570_s26, 4  ;;  %p518_p8 = scmp.ne.s32.totalorder %s654_s1, %s517_s30  ;;  %s29_s27 = int_to_ptr.vmem [resolvable:$true] %s28_s27 }
  0x15   :  { %p521_p9 = scmp.lt.u32.totalorder %s517_s30, %s654_s1 }
  0x17   :  { %p523_p10 = pnand %p521_p9, %p518_p8 }
  0x19   :  { %526 = shalt.err (!%p523_p10)
}
  0x1a   :  { %s527_s8 = scalar_lea.vmem %s29_s27, 768  ;;  %p532_p12 = scmp.lt.s32.totalorder %s29_s27, %s29_s27 }
  0x1b   :  { %p528_p11 = scmp.ne.s32.totalorder %s29_s27, %s527_s8  ;;  %p533_p13 = scmp.lt.s32.totalorder %s527_s8, %s527_s8 }
  0x1d   :  { %p534_p0 = por %p533_p13, %p532_p12 }
  0x1f   :  { %p535_p1 = pnand %p534_p0, %p528_p11 }
  0x21   :  { %538 = shalt.err (!%p535_p1)
}
  0x22   :  { %s571_s0 = smov 192   ;;  %s572_s9 = smov 12  }
  0x23   :  { %34 = dma.hbm_to_vmem [thread:$0]  %s654_s1, 768, %s29_s27, [#allocation6], %s571_s0, %s571_s0, %s572_s9  }
  0x24   :  { %561 = dma.done.wait [#allocation3], 256  }
  0x25   :  { %562 = vsyncadd [#allocation3], 4294967040 }
  0x26   :  { %563 = dma.done.wait [#allocation6], 768  }
  0x27   :  { %564 = vsyncadd [#allocation6], 4294966528  ;;  %v573_v0 = vmov 0   ;;  %v574_v1 = vmov 0.0   ;;  %v479_v2 = vld [vmem:[#allocation5 + $0x4] ss:$12 sps:$4 sm:$0xff]   ;;  %v57_v11 = vlaneseq }
  0x28   :  { %140 = vmatprep.mubr.bf16.mxu0 %v573_v0  ;;  %437 = vmatprep.subr.bf16.mxu1 %v574_v1  ;;  %v481_v3 = vld [vmem:[#allocation5] ss:$12 sps:$4 sm:$0xff]   ;;  %v482_v4 = vld [vmem:[#allocation5 + $0x1c] ss:$12 sps:$4 sm:$0xff]   ;;  %v484_v5 = vld [vmem:[#allocation5 + $0x18] ss:$12 sps:$4 sm:$0xff]  }
  0x29   :  { %108 = vmatprep.subr.bf16.mxu0 %v479_v2  ;;  %v44_v6 = vld [vmem:[#allocation2] sm:$0xff]  ;;  %v45_v7 = vld [vmem:[#allocation2 + $0x8] sm:$0xff]  ;;  %v486_v10 = vld [vmem:[#allocation5 + $0x20] ss:$12 sps:$4 sm:$0xff]   ;;  %vm104_vm0 = vcmask 261120   ;;  %vm575_vm1 = vmmov 0  }
  0x2a   :  { %109 = vmatpush1.bf16.msra.mxu0 %v481_v3  ;;  %v485_v8 = vld [vmem:[#allocation5 + $0x8] ss:$12 sps:$4 sm:$0xff]   ;;  %v46_v9 = vpack.c.bf16 %v45_v7, %v44_v6  ;;  %441 = vmatprep.mubr.msk.bf16.mxu1 %vm575_vm1, %v574_v1  ;;  %v58_v12 = vshrl.u32 %v57_v11, 7  ;;  %v55_v14 = vld [vmem:[%s655_s2] sm:$0x7]  ;;  %vm306_vm2 = vcmask 1043456  }
  0x2b   :  { %110 = vmatprep.subr.bf16.mxu0 %v482_v4  ;;  %438 = vmatpush3.bf16.msra.mxu1 %v485_v8  ;;  %vm276_vm3 = vcmask 64512   ;;  %s576_s2 = smov [#allocation7]  }
  0x2c   :  { %439 = vmatprep.subr.bf16.mxu1 %v574_v1  ;;  %v63_v13 = vsub.s32 1, %v58_v12  ;;  %v59_v16 = vsub.s32 0, %v58_v12  ;;  %v67_v30 = vsub.s32 2, %v58_v12  ;;  %s403_s13 = sshll.u32 %s576_s2, 4  ;;  %s404_s13 = int_to_ptr.vmem [resolvable:$true] %s403_s13 }
  0x2d   :  { %s539_s14 = scalar_lea.vmem %s404_s13, 256  ;;  %p544_p3 = scmp.lt.s32.totalorder %s404_s13, %s404_s13 }
  0x2e   :  { %111 = vmatpush1.bf16.msra.mxu0 %v484_v5  ;;  %v64_v15 = vrot.slane %v55_v14, %v63_v13  ;;  %v60_v21 = vrot.slane %v55_v14, %v59_v16  ;;  %v68_v31 = vrot.slane %v55_v14, %v67_v30  ;;  %p540_p2 = scmp.ne.s32.totalorder %s404_s13, %s539_s14  ;;  %p545_p4 = scmp.lt.s32.totalorder %s539_s14, %s539_s14 }
  0x2f   :  { %445 = vmatprep.subr.bf16.mxu0 %v574_v1  ;;  %440 = vmatpush3.bf16.msra.mxu1 %v486_v10 }
  0x30   :  { %451 = vmatprep.subr.bf16.mxu1 %v574_v1  ;;  %p546_p5 = por %p545_p4, %p544_p3 }
  0x31   :  { %422 = vmatmul.mubr.msk.bf16.vlgmr.msra.gmra.mrb[0].mxu0 %vm104_vm0, %v46_v9 }
  0x32   :  { %447 = vmatprep.mubr.msk.bf16.mxu0 %vm575_vm1, %v574_v1  ;;  %442 = vmatmul.mubr.msk.bf16.vlgmr.msra.gmra.mrb[0].mxu1 %vm104_vm0, %v46_v9  ;;  %p547_p6 = pnand %p546_p5, %p540_p2 }
  0x33   :  { %453 = vmatprep.mubr.msk.bf16.mxu1 %vm575_vm1, %v574_v1 }
 0x104   :  { %v142_v17 = vpop.f32.mrb[0].mxu0 }
 0x105   :  { %v144_v18 = vpop.f32.mrb[1].mxu0  ;;  %v143_v26 = vadd.f32 %v142_v17, %v60_v21  ;;  %v185_v32 = vpop.f32.mrb[0].mxu1 }
 0x106   :  { %v145_v19 = vadd.f32 %v144_v18, %v64_v15  ;;  %v146_v20 = vpop.f32.mrb[2].mxu0  ;;  %v186_v33 = vadd.f32 %v185_v32, %v68_v31  ;;  %v443_v34 = vpop.f32.mrb[1].mxu1 }
 0x107   :  { %v148_v22 = vpop.f32.mrb[3].mxu0  ;;  %v147_v27 = vadd.f32 %v146_v20, %v60_v21  ;;  %v192_v28 = vpack.c.bf16 %v143_v26, %v143_v26  ;;  %v188_v35 = vpop.f32.mrb[2].mxu1 }
 0x108   :  { %v194_v23 = vpack.c.bf16 %v145_v19, %v145_v19  ;;  %v149_v24 = vadd.f32 %v148_v22, %v64_v15  ;;  %v301_v36 = vpack.c.bf16 %v186_v33, %v186_v33  ;;  %v189_v37 = vadd.f32 %v188_v35, %v68_v31  ;;  %v444_v38 = vpop.f32.mrb[3].mxu1 }
 0x109   :  { %v193_v29 = vpack.c.bf16 %v147_v27, %v147_v27 }
 0x10a   :  { %v195_v25 = vpack.c.bf16 %v149_v24, %v149_v24  ;;  %446 = vmatpush3.bf16.xpose.msra.mxu0 %v194_v23  ;;  %v308_v39 = vsel %vm306_vm2, %v301_v36, 0  ;;  %v302_v40 = vpack.c.bf16 %v189_v37, %v189_v37 }
 0x10b   :  { %457 = vmatprep.subr.bf16.mxu0 %v574_v1 }
 0x10c   :  { %452 = vmatpush3.bf16.xpose.msra.mxu1 %v195_v25  ;;  %v354_v41 = vsel %vm306_vm2, %v302_v40, 0 }
 0x10d   :  { %463 = vmatprep.subr.bf16.mxu1 %v574_v1 }
 0x111   :  { %448 = vmatmul.mubr.bf16.vlgmr.msra.gmra.mrb[4].mxu0 %v192_v28 }
 0x112   :  { %459 = vmatprep.mubr.msk.bf16.mxu0 %vm575_vm1, %v574_v1  ;;  %458 = vmatpush3.bf16.msra.mxu0 %v308_v39 }
 0x113   :  { %454 = vmatmul.mubr.bf16.vlgmr.msra.gmra.mrb[4].mxu1 %v193_v29 }
 0x114   :  { %465 = vmatprep.mubr.msk.bf16.mxu1 %vm575_vm1, %v574_v1  ;;  %464 = vmatpush3.bf16.msra.mxu1 %v354_v41 }
 0x1e4   :  { %v230_v42 = vpop.f32.mrb[4].mxu0 }
 0x1e5   :  { %v449_v43 = vpop.f32.mrb[5].mxu0  ;;  %v277_v44 = vsel %vm276_vm3, %v230_v42, -inf }
 0x1e6   :  { %v270_v45 = vpop.f32.mrb[4].mxu1  ;;  %278 = vmax.xlane.f32.xlu0 %v277_v44  ;;  %v233_v46 = vpop.f32.mrb[6].mxu0 }
 0x1e7   :  { %v450_v47 = vpop.f32.mrb[7].mxu0  ;;  %v455_v48 = vpop.f32.mrb[5].mxu1  ;;  %v280_v51 = vsel %vm276_vm3, %v270_v45, -inf }
 0x1e8   :  { %v273_v49 = vpop.f32.mrb[6].mxu1 }
 0x1e9   :  { %v456_v50 = vpop.f32.mrb[7].mxu1 }
 0x1ea   :  { %281 = vmax.xlane.f32.xlu0 %v280_v51 }
 0x273   :  { %v279_v52 = vpop.xlane.xlu0 %278 }
 0x274   :  { %v283_v53 = vsub.f32 %v230_v42, %v279_v52 }
 0x276   :  { %v285_v54 = vmul.f32 1.442695, %v283_v53 }
 0x277   :  { %v282_v55 = vpop.xlane.xlu0 %281 }
 0x278   :  { %487 = vpow2.f32 %v285_v54  ;;  %v284_v56 = vsub.f32 %v270_v45, %v282_v55 }
 0x27a   :  { %v287_v57 = vmul.f32 1.442695, %v284_v56 }
 0x27c   :  { %489 = vpow2.f32 %v287_v57 }
 0x282   :  { %v488_v58 = vpop.eup %487 }
 0x283   :  { %v289_v59 = vsel %vm276_vm3, %v488_v58, 0.0 }
 0x284   :  { %290 = vadd.xlane.f32.xlu1 %v289_v59 }
 0x286   :  { %v490_v60 = vpop.eup %489 }
 0x287   :  { %v292_v61 = vsel %vm276_vm3, %v490_v60, 0.0 }
 0x288   :  { %293 = vadd.xlane.f32.xlu1 %v292_v61 }
 0x311   :  { %v291_v62 = vpop.xlane.xlu1 %290 }
 0x312   :  { %491 = vrcp.f32 %v291_v62 }
 0x315   :  { %v294_v63 = vpop.xlane.xlu1 %293 }
 0x316   :  { %493 = vrcp.f32 %v294_v63 }
 0x31c   :  { %v492_v0 = vpop.eup %491 }
 0x31d   :  { %v297_v1 = vmul.f32 %v492_v0, %v488_v58 }
 0x31f   :  { %v299_v2 = vpack.c.bf16 %v297_v1, %v297_v1 }
 0x320   :  { %v494_v3 = vpop.eup %493 }
 0x321   :  { %v298_v4 = vmul.f32 %v494_v3, %v490_v60  ;;  %460 = vmatmul.mubr.msk.bf16.vlgmr.msra.gmra.mrb[8].mxu0 %vm276_vm3, %v299_v2 }
 0x323   :  { %v300_v5 = vpack.c.bf16 %v298_v4, %v298_v4 }
 0x325   :  { %466 = vmatmul.mubr.msk.bf16.vlgmr.msra.gmra.mrb[8].mxu1 %vm276_vm3, %v300_v5 }
 0x3f4   :  { %v344_v6 = vpop.f32.mrb[8].mxu0 }
 0x3f5   :  { %396 = vst [vmem:[#allocation7] sm:$0xff] %v344_v6  ;;  %v461_v7 = vpop.f32.mrb[9].mxu0 }
 0x3f6   :  { %v347_v8 = vpop.f32.mrb[10].mxu0 }
 0x3f7   :  { %v462_v9 = vpop.f32.mrb[11].mxu0 }
 0x3f8   :  { %v390_v10 = vpop.f32.mrb[8].mxu1 }
 0x3f9   :  { %397 = vst [vmem:[#allocation7 + $0x8] sm:$0xff] %v390_v10  ;;  %v467_v11 = vpop.f32.mrb[9].mxu1 }
 0x3fa   :  { %v393_v12 = vpop.f32.mrb[10].mxu1 }
 0x3fb   :  { %550 = shalt.err (!%p547_p6)
}
 0x3fc   :  { %s551_s17 = scalar_lea.hbm %s656_s3, 256 }
 0x3fd   :  { %p552_p7 = scmp.ne.s32.totalorder %s656_s3, %s551_s17  ;;  %p555_p8 = scmp.lt.u32.totalorder %s551_s17, %s656_s3 }
 0x3ff   :  { %p557_p9 = pnand %p555_p8, %p552_p7 }
 0x401   :  { %560 = shalt.err (!%p557_p9)
}
 0x402   :  { %409 = dma.vmem_to_hbm [thread:$0]  %s404_s13, 256, %s656_s3, [#allocation4], %s568_s22, %s568_s22, %s569_s23   ;;  %v468_v13 = vpop.f32.mrb[11].mxu1 }
 0x403   :  { %565 = dma.done.wait [#allocation4], 256  }
 0x404   :  { %566 = vsyncadd [#allocation4], 4294967040 }
 0x405   :  { %413 = vsyncpa [#allocation3], 1 }
 0x406   :  { %414 = vsyncpa [#allocation6], 1 }
 0x407   :  { %415 = vsyncpa [#allocation4], 1 }

</bundles_post_ra>
